<compile_context>
chip_gen: v7x
topology: tpu7x:2x2x1
jax: 0.10.0
libtpu: 0.0.40
codegen_flags: <defaults>
</compile_context>

<pallas_src>
from functools import partial

import jax
import jax.numpy as jnp
from jax import lax
from jax.experimental import pallas as pl
from jax.experimental.pallas import tpu as pltpu


def _round_up(x: int, m: int) -> int:
    return (x + m - 1) // m * m


def _vmem_limit_bytes() -> int:
    """Derive a safe scoped-VMEM limit from the actual chip (v7x: 64 MiB, v5e/v6e: 128 MiB)."""
    try:
        cap = int(pltpu.get_tpu_info().vmem_capacity_bytes)
    except Exception:
        cap = 64 * 1024 * 1024          # conservative fallback (v7x-sized)
    return min(cap * 3 // 4, 100 * 1024 * 1024)   # 48 MiB on v7x, 96 MiB on v5e/v6e


def _pick_tile(B: int, K: int, Ep: int, in_item: int, mm_item: int,
               block_b: int, vmem_limit: int) -> int:
    """Pick the batch tile (rows per grid step), multiple of 8, sized to VMEM."""
    lane = 128
    budget = max(vmem_limit - 8 * 1024 * 1024, 4 * 1024 * 1024)
    # resident (double-buffered) weights + slack
    fixed = 2 * _round_up(K, 8) * Ep * mm_item + 2 * 8 * Ep * 4 + (2 << 20)
    per_row = (2 * _round_up(3 * K, lane) * in_item   # x block, double-buffered
               + 4 * _round_up(K, lane) * mm_item     # in-kernel slices/diffs (+relayout temps)
               + 6 * Ep * 4                           # f32 matmul outputs / normalize temps
               + 2 * lane * 4)                        # (tm, 2) out block, lane-padded, 2 bufs
    tm_cap = max(8, (budget - fixed) // per_row // 8 * 8)
    tm_cap = min(tm_cap, max(8, block_b // 8 * 8))
    if B >= 1024:                                     # keep >=2 grid steps for v7x's 2 TCs
        tm_cap = min(tm_cap, max(8, _round_up((B + 1) // 2, 8)))
    # Prefer a tile that divides B exactly -> no host-side batch padding copy.
    cand = tm_cap
    while cand >= 8:
        if B % cand == 0:
            return cand
        cand -= 8
    return min(tm_cap, _round_up(B, 8))


def _make_triplet_kernel(K: int, scaling: bool, mm_dtype):
    """Kernel for one batch tile: x_ref (tm, 3K) raw dtype, w_ref (K, Ep) mm_dtype,
    [b_ref (1, Ep) f32 when scaling], o_ref (tm, 2) f32 (col0=d_pos, col1=d_neg)."""

    def kernel(x_ref, w_ref, *rest):
        if scaling:
            b_ref, o_ref = rest
        else:
            (o_ref,) = rest

        w = w_ref[...]                                  # (K, Ep), resident across grid steps
        cdims = (((1,), (0,)), ((), ()))                # contract K

        xa = x_ref[:, 0 * K:1 * K]                      # (tm, K) lane slices of the tile
        if not scaling:
            # bias cancels exactly: ||(Wa+b)-(Wp+b)|| = ||W(a-p)||  -> 2 matmuls, no bias.
            d_p = (xa - x_ref[:, 1 * K:2 * K]).astype(mm_dtype)
            d_n = (xa - x_ref[:, 2 * K:3 * K]).astype(mm_dtype)
            e_p = lax.dot_general(d_p, w, cdims, preferred_element_type=jnp.float32)  # (tm, Ep)
            e_n = lax.dot_general(d_n, w, cdims, preferred_element_type=jnp.float32)
            dpos = jnp.sqrt(jnp.sum(e_p * e_p, axis=1, keepdims=True))                # (tm, 1)
            dneg = jnp.sqrt(jnp.sum(e_n * e_n, axis=1, keepdims=True))
        else:
            b = b_ref[...]                              # (1, Ep) f32
            def embed_unit(xi):
                e = lax.dot_general(xi.astype(mm_dtype), w, cdims,
                                    preferred_element_type=jnp.float32) + b           # (tm, Ep)
                ss = jnp.sum(e * e, axis=1, keepdims=True)
                # == e / max(||e||, 1e-12), i.e. F.normalize(e, p=2, dim=1); radius applied outside.
                return e * lax.rsqrt(jnp.maximum(ss, 1e-24))
            ea = embed_unit(xa)
            ep = embed_unit(x_ref[:, 1 * K:2 * K])
            en = embed_unit(x_ref[:, 2 * K:3 * K])
            dpos = jnp.sqrt(jnp.sum((ea - ep) ** 2, axis=1, keepdims=True))
            dneg = jnp.sqrt(jnp.sum((ea - en) ** 2, axis=1, keepdims=True))

        o_ref[:, 0:1] = dpos                            # direct stores, no concat
        o_ref[:, 1:2] = dneg

    return kernel


@partial(jax.jit, static_argnames=("scaling", "block_b", "matmul_dtype"))
def triplet_encoder_forward(sequence, w, b, radius=0.5, *, scaling=False,
                            block_b=2048, matmul_dtype=jnp.bfloat16):
    """sequence: (B, 3, N, A); w: (N*A, E); b: (E,); radius: traced scalar (used iff scaling).
    Returns (distance_positive, distance_negative), each (B,) f32."""
    B, C, N, A = sequence.shape
    assert C == 3, "triplet dim must be 3"
    K = N * A
    assert w.shape[0] == K
    E = w.shape[1]
    Ep = _round_up(E, 128)                               # lane-align embedding dim only

    # Free view of the input: (B, 3K), a/p/n contiguous per row. No transpose, no K-pad, no cast.
    x = sequence.reshape(B, 3 * K)
    in_item = jnp.dtype(x.dtype).itemsize
    mm_item = jnp.dtype(matmul_dtype).itemsize

    vmem_limit = _vmem_limit_bytes()
    tm = _pick_tile(B, K, Ep, in_item, mm_item, int(block_b), vmem_limit)
    Bp = _round_up(B, tm)
    if Bp != B:                                          # only copies when no 8-aligned tile divides B
        x = jnp.pad(x, ((0, Bp - B), (0, 0)))

    wt = jnp.pad(w, ((0, 0), (0, Ep - E))).astype(matmul_dtype)   # (K, Ep), tiny one-time prep

    kernel = _make_triplet_kernel(K, bool(scaling), matmul_dtype)
    in_specs = [pl.BlockSpec((tm, 3 * K), lambda i: (i, 0)),      # batch-tiled raw input
                pl.BlockSpec((K, Ep), lambda i: (0, 0))]          # weights stay resident
    args = [x, wt]
    if scaling:
        bt = jnp.pad(b.astype(jnp.float32), (0, Ep - E)).reshape(1, Ep)
        in_specs.append(pl.BlockSpec((1, Ep), lambda i: (0, 0)))  # bias only needed when scaling
        args.append(bt)

    n_mm = 3 if scaling else 2
    flops = 2 * Bp * K * Ep * n_mm + 8 * Bp * Ep * n_mm
    bytes_accessed = Bp * 3 * K * in_item + K * Ep * mm_item + Ep * 4 + Bp * 2 * 4
    transcendentals = (3 * Bp if scaling else 0) + 2 * Bp

    out = pl.pallas_call(
        kernel,
        out_shape=jax.ShapeDtypeStruct((Bp, 2), jnp.float32),
        grid=(Bp // tm,),
        in_specs=in_specs,
        out_specs=pl.BlockSpec((tm, 2), lambda i: (i, 0)),
        compiler_params=pltpu.CompilerParams(
            dimension_semantics=("parallel",),
            vmem_limit_bytes=int(vmem_limit)),
        cost_estimate=pl.CostEstimate(
            flops=int(flops),
            transcendentals=int(transcendentals),
            bytes_accessed=int(bytes_accessed)),
    )(*args)

    dp, dn = out[:B, 0], out[:B, 1]
    if scaling:
        # dist(r*â, r*p̂) = r * dist(â, p̂): apply the clamped radius outside the kernel
        # so it stays a traced value (no recompile, matches radius.clamp(1e-7, 1e10)).
        r = jnp.clip(jnp.asarray(radius, jnp.float32), 1e-7, 1e10)
        dp = dp * r
        dn = dn * r
    return dp, dn


def _reference_forward(sequence, w, b, *, scaling=False, radius=0.5):
    """Pure-JAX reference mirroring the PyTorch forward (euclidean distance)."""
    B = sequence.shape[0]
    seq = sequence.astype(jnp.float32).reshape(3 * B, -1)
    enc = seq @ w.astype(jnp.float32) + b.astype(jnp.float32)
    if scaling:
        norm = jnp.sqrt(jnp.sum(enc * enc, axis=1, keepdims=True))
        r = jnp.clip(jnp.float32(radius), 1e-7, 1e10)
        enc = enc / jnp.maximum(norm, 1e-12) * r
    enc = enc.reshape(B, 3, -1)
    dp = jnp.linalg.norm(enc[:, 0] - enc[:, 1], axis=-1)
    dn = jnp.linalg.norm(enc[:, 0] - enc[:, 2], axis=-1)
    return dp, dn


if __name__ == "__main__":
    key = jax.random.PRNGKey(0)
    k_seq, k_w, k_b = jax.random.split(key, 3)

    B, N, A, E = 2, 8, 4, 32                 # (batch, seq-len, alphabet, embed-dim)
    sequence = jax.random.normal(k_seq, (B, 3, N, A), dtype=jnp.float32)

    # Deterministic synthetic parameters for the linear embedding model.
    w = 0.1 * jax.random.normal(k_w, (N * A, E), dtype=jnp.float32)
    b = 0.1 * jax.random.normal(k_b, (E,), dtype=jnp.float32)

    ok = True

    # f32-matmul path: tight check against the pure-JAX reference (both scaling modes).
    for scaling in (False, True):
        dp, dn = triplet_encoder_forward(sequence, w, b, 0.5, scaling=scaling,
                                         matmul_dtype=jnp.float32)
        jax.block_until_ready((dp, dn))
        dp_ref, dn_ref = _reference_forward(sequence, w, b, scaling=scaling, radius=0.5)
        ok &= bool(jnp.allclose(dp, dp_ref, atol=1e-4, rtol=1e-4))
        ok &= bool(jnp.allclose(dn, dn_ref, atol=1e-4, rtol=1e-4))

    # Default bf16-matmul path (f32 accumulation / epilogue): loose check.
    for scaling in (False, True):
        dp, dn = triplet_encoder_forward(sequence, w, b, 0.5, scaling=scaling)
        jax.block_until_ready((dp, dn))
        dp_ref, dn_ref = _reference_forward(sequence, w, b, scaling=scaling, radius=0.5)
        ok &= bool(jnp.allclose(dp, dp_ref, atol=5e-2, rtol=5e-2))
        ok &= bool(jnp.allclose(dn, dn_ref, atol=5e-2, rtol=5e-2))

    if ok:
        print("KERNEL_OK")
    else:
        print("MISMATCH")
</pallas_src>

<mosaic_0001>
module attributes {stable_mosaic.version = 11 : i64} {
  func.func @kernel(%arg0: i32, %arg1: memref<8x96xf32, #tpu.memory_space<vmem>>, %arg2: memref<32x128xf32, #tpu.memory_space<vmem>>, %arg3: memref<8x2xf32, #tpu.memory_space<vmem>>) attributes {dimension_semantics = [#tpu.dimension_semantics<parallel>], iteration_bounds = array<i64: 1>, scalar_prefetch = 0 : i64, scratch_operands = 0 : i64, tpu.core_type = #tpu.core_type<tc>, window_params = [{transform_indices = @transform_0, window_bounds = array<i64: 8, 96>}, {pipeline_mode = #tpu.pipeline_mode<synchronous>, transform_indices = @transform_1, window_bounds = array<i64: 32, 128>}, {transform_indices = @transform_2, window_bounds = array<i64: 8, 2>}]} {
    %c0 = arith.constant 0 : index
    %c0_0 = arith.constant 0 : index
    %0 = vector.load %arg2[%c0, %c0_0] : memref<32x128xf32, #tpu.memory_space<vmem>>, vector<32x128xf32>
    %c0_1 = arith.constant 0 : index
    %c0_2 = arith.constant 0 : index
    %1 = vector.load %arg1[%c0_1, %c0_2] : memref<8x96xf32, #tpu.memory_space<vmem>>, vector<8x32xf32>
    %c0_3 = arith.constant 0 : index
    %c32 = arith.constant 32 : index
    %2 = vector.load %arg1[%c0_3, %c32] : memref<8x96xf32, #tpu.memory_space<vmem>>, vector<8x32xf32>
    %3 = arith.subf %1, %2 : vector<8x32xf32>
    %c0_4 = arith.constant 0 : index
    %c64 = arith.constant 64 : index
    %4 = vector.load %arg1[%c0_4, %c64] : memref<8x96xf32, #tpu.memory_space<vmem>>, vector<8x32xf32>
    %5 = arith.subf %1, %4 : vector<8x32xf32>
    %cst = arith.constant dense<0.000000e+00> : vector<8x128xf32>
    %6 = tpu.matmul %3, %0, %cst {dimension_numbers = #tpu.dot_dimension_numbers<[1], [0], [0], [1], [0, 0, 1, 1], [], []>} : vector<8x32xf32>, vector<32x128xf32>, vector<8x128xf32> -> vector<8x128xf32>
    %cst_5 = arith.constant dense<0.000000e+00> : vector<8x128xf32>
    %7 = tpu.matmul %5, %0, %cst_5 {dimension_numbers = #tpu.dot_dimension_numbers<[1], [0], [0], [1], [0, 0, 1, 1], [], []>} : vector<8x32xf32>, vector<32x128xf32>, vector<8x128xf32> -> vector<8x128xf32>
    %8 = arith.mulf %6, %6 : vector<8x128xf32>
    %cst_6 = arith.constant dense<0.000000e+00> : vector<8xf32>
    %9 = vector.multi_reduction <add>, %8, %cst_6 [1] : vector<8x128xf32> to vector<8xf32>
    %10 = vector.shape_cast %9 : vector<8xf32> to vector<8x1xf32>
    %11 = math.sqrt %10 : vector<8x1xf32>
    %12 = arith.mulf %7, %7 : vector<8x128xf32>
    %cst_7 = arith.constant dense<0.000000e+00> : vector<8xf32>
    %13 = vector.multi_reduction <add>, %12, %cst_7 [1] : vector<8x128xf32> to vector<8xf32>
    %14 = vector.shape_cast %13 : vector<8xf32> to vector<8x1xf32>
    %15 = math.sqrt %14 : vector<8x1xf32>
    %c0_8 = arith.constant 0 : index
    %c0_9 = arith.constant 0 : index
    %16 = vector.load %arg3[%c0_8, %c0_9] : memref<8x2xf32, #tpu.memory_space<vmem>>, vector<8x1xf32>
    tpu.vector_store %arg3[%c0_8, %c0_9], %11 {strides = array<i32>} : memref<8x2xf32, #tpu.memory_space<vmem>>, vector<8x1xf32>,
    %c0_10 = arith.constant 0 : index
    %c1 = arith.constant 1 : index
    %17 = vector.load %arg3[%c0_10, %c1] : memref<8x2xf32, #tpu.memory_space<vmem>>, vector<8x1xf32>
    tpu.vector_store %arg3[%c0_10, %c1], %15 {strides = array<i32>} : memref<8x2xf32, #tpu.memory_space<vmem>>, vector<8x1xf32>,
    return
  }
  func.func @transform_0(%arg0: i32) -> (i32, i32) {
    %c0_i32 = arith.constant 0 : i32
    %c0_i32_0 = arith.constant 0 : i32
    return %arg0, %c0_i32 : i32, i32
  }
  func.func @transform_1(%arg0: i32) -> (i32, i32) {
    %c0_i32 = arith.constant 0 : i32
    %c0_i32_0 = arith.constant 0 : i32
    %c0_i32_1 = arith.constant 0 : i32
    return %c0_i32, %c0_i32_0 : i32, i32
  }
  func.func @transform_2(%arg0: i32) -> (i32, i32) {
    %c0_i32 = arith.constant 0 : i32
    %c0_i32_0 = arith.constant 0 : i32
    return %arg0, %c0_i32 : i32, i32
  }
}

</mosaic_0001>

<bundles_post_ra>
// kernel: triplet_encoder_forward.1
= control target key start
LH: loop header
LB: loop body
LE: loop exit
PB: predicated region body
PF: predicated region fallthrough
CT: control target
= control target key end

     0   :  { %v255_v1 = vmov 0.0|0.0   ;;  %s256_s15 = smov 96   ;;  %vm257_vm0 = vmmov 0   ;;  %v258_v7 = vmov 0.0   ;;  %s259_s19 = smov 64   ;;  %vm25_vm1 = vcmask 261120   ;;  %s296_s0 = inlined_call_operand.vmem [shape: f32[8,96], index: 0, kind: input, shape index: {}]   ;;  %s297_s1 = inlined_call_operand.vmem [shape: f32[32,128], index: 1, kind: input, shape index: {}]   ;;  %s298_s2 = inlined_call_operand.vmem [shape: f32[8,2], index: 2, kind: output, shape index: {}]  }
   0x1   :  { %v15_v0 = vld [vmem:[%s296_s0] sm:$0xff]  ;;  %234 = vmatprep.subr.bf16.mxu0 %v255_v1  ;;  %v12_v3 = vld [vmem:[%s297_s1 + $0x8] sm:$0xff]  ;;  %240 = vmatprep.subr.bf16.mxu1 %v255_v1  ;;  %v13_v5 = vld [vmem:[%s297_s1 + $0x10] sm:$0xff]  ;;  %vm192_vm2 = vcmask 7168   ;;  %vm194_vm5 = vcmask 15368  }
   0x2   :  { %v11_v2 = vld [vmem:[%s297_s1] sm:$0xff]  ;;  %17 = vrot.lane.b32.xlu0 %v15_v0, %s256_s15  ;;  %v14_v6 = vld [vmem:[%s297_s1 + $0x18] sm:$0xff]  ;;  %220 = vmatprep.mubr.msk.f32.mxu0 %vm257_vm0, %v258_v7 }
   0x3   :  { %v235_v4 = vpack.c.bf16 %v12_v3, %v11_v2  ;;  %231 = vmatprep.mubr.msk.f32.mxu1 %vm257_vm0, %v258_v7  ;;  %v238_v8 = vpack.c.bf16 %v14_v6, %v13_v5 }
   0x5   :  { %236 = vmatpush3.bf16.msra.mxu0 %v235_v4  ;;  %242 = vmatpush3.bf16.msra.mxu1 %v235_v4 }
   0x6   :  { %237 = vmatprep.subr.bf16.mxu0 %v255_v1  ;;  %243 = vmatprep.subr.bf16.mxu1 %v255_v1 }
   0x7   :  { %21 = vrot.lane.b32.xlu0 %v15_v0, %s259_s19 }
   0x9   :  { %239 = vmatpush3.bf16.msra.mxu0 %v238_v8  ;;  %245 = vmatpush3.bf16.msra.mxu1 %v238_v8 }
  0x74   :  { %v18_v9 = vpop.permute.xlu0 %17 }
  0x75   :  { %v20_v10 = vsub.f32 %v15_v0, %v18_v9 }
  0x77   :  { %221 = vmatmul.mubr.msk.f32.vlgmr.msra.gmra.mrb[0].mxu0 %vm25_vm1, %v20_v10 }
  0x79   :  { %v22_v11 = vpop.permute.xlu0 %21 }
  0x7a   :  { %v24_v12 = vsub.f32 %v15_v0, %v22_v11 }
  0x7c   :  { %232 = vmatmul.mubr.msk.f32.vlgmr.msra.gmra.mrb[0].mxu1 %vm25_vm1, %v24_v12 }
 0x14a   :  { %v95_v13 = vpop.f32.mrb[0].mxu0 }
 0x14b   :  { %v222_v14 = vpop.f32.mrb[1].mxu0  ;;  %v172_v15 = vmul.f32 %v95_v13, %v95_v13 }
 0x14d   :  { %173 = vadd.xlane.f32.xlu1 %v172_v15 }
 0x14f   :  { %v168_v16 = vpop.f32.mrb[0].mxu1 }
 0x150   :  { %v182_v17 = vmul.f32 %v168_v16, %v168_v16  ;;  %v233_v18 = vpop.f32.mrb[1].mxu1 }
 0x152   :  { %183 = vadd.xlane.f32.xlu1 %v182_v17 }
 0x1da   :  { %v174_v19 = vpop.xlane.xlu1 %173 }
 0x1db   :  { %251 = vrsqrt.f32 %v174_v19  ;;  %vm177_vm3 = vcmp.eq.f32.partialorder %v174_v19, inf  ;;  %v180_v23 = vand.u32 2147483648, %v174_v19  ;;  %vm179_vm4 = vcmp.eq.f32.partialorder %v174_v19, 0.0 }
 0x1df   :  { %v184_v20 = vpop.xlane.xlu1 %183 }
 0x1e0   :  { %253 = vrsqrt.f32 %v184_v20  ;;  %vm187_vm6 = vcmp.eq.f32.partialorder %v184_v20, inf  ;;  %v190_v28 = vand.u32 2147483648, %v184_v20  ;;  %vm189_vm7 = vcmp.eq.f32.partialorder %v184_v20, 0.0 }
 0x1e5   :  { %v252_v21 = vpop.eup %251 }
 0x1e6   :  { %v176_v22 = vmul.f32 %v252_v21, %v174_v19 }
 0x1e8   :  { %v178_v24 = vsel %vm177_vm3, %v174_v19, %v176_v22 }
 0x1e9   :  { %v181_v26 = vsel %vm179_vm4, %v180_v23, %v178_v24 }
 0x1ea   :  { %v254_v25 = vpop.eup %253  ;;  %193 = vst.msk [vmem:[%s298_s2] sm:$0xff] %vm192_vm2, %v181_v26 }
 0x1eb   :  { %v186_v27 = vmul.f32 %v254_v25, %v184_v20 }
 0x1ed   :  { %v188_v29 = vsel %vm187_vm6, %v184_v20, %v186_v27 }
 0x1ee   :  { %v191_v30 = vsel %vm189_vm7, %v190_v28, %v188_v29 }
 0x1ef   :  { %195 = vst.msk [vmem:[%s298_s2] sm:$0xff] %vm194_vm5, %v191_v30 }

</bundles_post_ra>
